<compile_context>
chip_gen: v5e
topology: v5e:2x2
jax: 0.10.0
libtpu: 0.0.40
codegen_flags: <defaults>
</compile_context>

<pallas_src>
import functools

import jax
import jax.numpy as jnp
from jax import lax
from jax.experimental import pallas as pl
from jax.experimental.pallas import tpu as pltpu

_LANE = 128      # vreg / MXU lane width
_SUBLANE = 8
_NEG_INF = -1e30


# ----------------------------------------------------------------------------
# Helpers: padding / chip-aware tiling & VMEM budgeting
# ----------------------------------------------------------------------------
def _round_up(x, m):
    return (x + m - 1) // m * m


def _pad2d(a, rows, cols):
    r, c = a.shape
    if r == rows and c == cols:
        return a
    return jnp.pad(a, ((0, rows - r), (0, cols - c)))


def _chip_config():
    """Generation-aware (cap_bytes, bf16_eup, row_tile_target)."""
    gen = 0
    try:
        kind = jax.devices()[0].device_kind.lower()
        for g in (7, 6, 5, 4):
            if (f"v{g}" in kind) or (f"tpu{g}" in kind):
                gen = g
                break
    except Exception:
        gen = 0
    # v7x: 64 MiB VMEM per TensorCore; v4/v5e/v6e: 128 MiB.  Unknown -> tighter.
    physical = (128 << 20) if 4 <= gen <= 6 else (64 << 20)
    cap = int(physical * 0.85)          # headroom for Mosaic internal scratch
    bf16_eup = gen >= 6                 # bf16 EUP/VPU exist on v6e / v7x only
    row_target = 1024 if physical >= (128 << 20) else 512
    return cap, bf16_eup, row_target


def _vmem_limit_bytes(estimate, cap):
    # 2x headroom for pipeline bookkeeping; floor 16 MiB, cap per generation.
    return int(min(max(2 * estimate, 16 << 20), cap))


def _choose_row_tile(n8, target, cap, est_fn):
    """Largest row tile (multiple of 8) whose VMEM estimate fits ~half the cap."""
    tm = min(_round_up(target, _SUBLANE), n8)
    while tm > _SUBLANE and est_fn(tm) > cap // 2:
        tm = _round_up(tm // 2, _SUBLANE)
    return tm


# ----------------------------------------------------------------------------
# Kernel 1: fused 2-layer MLP encoder  (forward pass of GraFN)
#   rep = relu(x @ W1 + b1) @ W2 + b2     (bf16 MXU, f32 accumulation / VPU)
# ----------------------------------------------------------------------------
def _encoder_kernel(x_ref, w1_ref, b1_ref, w2_ref, b2_ref, o_ref):
    h = jnp.dot(x_ref[...], w1_ref[...], preferred_element_type=jnp.float32)
    h = jnp.maximum(h + b1_ref[...], 0.0)
    out = jnp.dot(h.astype(w2_ref.dtype), w2_ref[...],
                  preferred_element_type=jnp.float32)
    o_ref[...] = (out + b2_ref[...]).astype(o_ref.dtype)


def grafn_forward(x, w1, b1, w2, b2):
    """forward(x) == encoder(x); standalone f32 rep (module semantics)."""
    cap, _, row_target = _chip_config()
    n, d_in = x.shape
    d_hid = w1.shape[1]
    d_out = w2.shape[1]

    d_in_p = _round_up(d_in, _LANE)
    d_hid_p = _round_up(d_hid, _LANE)
    d_out_p = _round_up(d_out, _LANE)
    n8 = _round_up(n, _SUBLANE)

    def est(tm):
        return (2 * tm * d_in_p * 2 + 2 * tm * d_out_p * 4
                + 2 * (d_in_p * d_hid_p + d_hid_p * d_out_p) * 2
                + 2 * (d_hid_p + d_out_p) * 4
                + tm * d_hid_p * 4 + tm * d_out_p * 4)

    tm = _choose_row_tile(n8, row_target, cap, est)
    n_p = _round_up(n8, tm)

    xp = _pad2d(x, n_p, d_in_p).astype(jnp.bfloat16)
    w1p = _pad2d(w1, d_in_p, d_hid_p).astype(jnp.bfloat16)
    b1p = _pad2d(b1, 1, d_hid_p).astype(jnp.float32)
    w2p = _pad2d(w2, d_hid_p, d_out_p).astype(jnp.bfloat16)
    b2p = _pad2d(b2, 1, d_out_p).astype(jnp.float32)

    # TODO(synk): on v7x, add a K grid axis over d_in (f32 acc scratch, K axis
    # last, "arbitrary") when resident W1 approaches half the 64 MiB budget.
    out = pl.pallas_call(
        _encoder_kernel,
        out_shape=jax.ShapeDtypeStruct((n_p, d_out_p), jnp.float32),
        grid_spec=pltpu.PrefetchScalarGridSpec(
            num_scalar_prefetch=0,
            grid=(n_p // tm,),
            in_specs=[
                pl.BlockSpec((tm, d_in_p), lambda i: (i, 0)),       # streamed rows
                pl.BlockSpec((d_in_p, d_hid_p), lambda i: (0, 0)),  # resident W1
                pl.BlockSpec((1, d_hid_p), lambda i: (0, 0)),       # resident b1
                pl.BlockSpec((d_hid_p, d_out_p), lambda i: (0, 0)), # resident W2
                pl.BlockSpec((1, d_out_p), lambda i: (0, 0)),       # resident b2
            ],
            out_specs=pl.BlockSpec((tm, d_out_p), lambda i: (i, 0)),
        ),
        compiler_params=pltpu.CompilerParams(
            dimension_semantics=("parallel",),
            vmem_limit_bytes=_vmem_limit_bytes(est(tm), cap)),
    )(xp, w1p, b1p, w2p, b2p)
    return out[:n, :d_out]


# ----------------------------------------------------------------------------
# Kernel 2: row-wise L2 normalization (F.normalize, eps=1e-12) for the supports.
# Run ONCE; the result is transposed once on the host so the per-tile logits
# matmul never relayouts its RHS.
# ----------------------------------------------------------------------------
def _l2norm_kernel(x_ref, o_ref):
    x = x_ref[...].astype(jnp.float32)
    # x / max(||x||, 1e-12) == x * rsqrt(max(||x||^2, 1e-24))
    inv = lax.rsqrt(jnp.maximum(jnp.sum(x * x, axis=-1, keepdims=True), 1e-24))
    o_ref[...] = (x * inv).astype(o_ref.dtype)


def _l2_normalize_rows(x_padded, *, out_dtype, row_target):
    n_p, d_p = x_padded.shape          # already (8, 128)-aligned by the caller
    tm = min(_round_up(row_target, _SUBLANE), n_p)
    n_pp = _round_up(n_p, tm)
    xp = _pad2d(x_padded, n_pp, d_p)
    out = pl.pallas_call(
        _l2norm_kernel,
        out_shape=jax.ShapeDtypeStruct((n_pp, d_p), out_dtype),
        grid_spec=pltpu.PrefetchScalarGridSpec(
            num_scalar_prefetch=0,
            grid=(n_pp // tm,),
            in_specs=[pl.BlockSpec((tm, d_p), lambda i: (i, 0))],
            out_specs=pl.BlockSpec((tm, d_p), lambda i: (i, 0)),
        ),
        compiler_params=pltpu.CompilerParams(
            dimension_semantics=("parallel",)),
    )(xp)
    return out[:n_p]


def _prep_supports(supports, labels, *, row_target):
    """Normalize + transpose supports once; bf16 labels; additive pad-mask bias."""
    ns, d = supports.shape
    c = labels.shape[1]
    d_p = _round_up(d, _LANE)
    ns_p = _round_up(ns, _LANE)
    c_p = _round_up(c, _LANE)

    sp = _pad2d(supports, ns_p, d_p).astype(jnp.float32)
    sn = _l2_normalize_rows(sp, out_dtype=jnp.bfloat16, row_target=row_target)
    snt = jnp.transpose(sn)                      # [d_p, ns_p] — paid once, off hot loop
    lp = _pad2d(labels, ns_p, c_p).astype(jnp.bfloat16)   # one-hot -> exact in bf16

    apply_mask = ns != ns_p                      # static: skip masking when lane-aligned
    bias = jnp.where(jnp.arange(ns_p) < ns, 0.0, _NEG_INF)
    bias = bias.astype(jnp.float32).reshape(1, ns_p)
    return snt, lp, bias, d_p, ns_p, c_p, apply_mask


# ----------------------------------------------------------------------------
# Shared snn math (traced inside the kernels):
#   softmax(normalize(q) @ supports_n.T / tau) @ labels
# ----------------------------------------------------------------------------
def _snn_from_f32_query(q_f32, snt_ref, l_ref, bias_ref, *, inv_tau, apply_mask,
                        bf16_exp, out_dtype):
    # normalize in f32 (matches F.normalize); fold 1/tau into the [tm, d] scale
    qinv = lax.rsqrt(jnp.maximum(
        jnp.sum(q_f32 * q_f32, axis=-1, keepdims=True), 1e-24))
    qn = (q_f32 * (qinv * inv_tau)).astype(snt_ref.dtype)

    # cosine logits on the MXU against resident, pre-transposed supports
    logits = jnp.dot(qn, snt_ref[...], preferred_element_type=jnp.float32)
    if apply_mask:                                   # static flag (fake supports only)
        logits = logits + bias_ref[...]              # resident [1, ns_p] additive mask

    # numerically-stable softmax; reciprocal on the (otherwise idle) EUP slot
    m = jnp.max(logits, axis=-1, keepdims=True)
    z = logits - m
    if bf16_exp:                                     # bf16 EUP on v6e / v7x
        e = jnp.exp(z.astype(jnp.bfloat16))
        s = jnp.sum(e.astype(jnp.float32), axis=-1, keepdims=True)
        p = e * pl.reciprocal(s, approx=True).astype(jnp.bfloat16)
    else:                                            # v5e: f32 EUP only
        e = jnp.exp(z)
        s = jnp.sum(e, axis=-1, keepdims=True)
        p = (e * pl.reciprocal(s, approx=True)).astype(jnp.bfloat16)

    # probs @ labels in bf16 (one-hot exact), f32 accumulation
    return jnp.dot(p, l_ref[...],
                   preferred_element_type=jnp.float32).astype(out_dtype)


def _snn_kernel(q_ref, snt_ref, l_ref, bias_ref, o_ref,
                *, inv_tau, apply_mask, bf16_exp):
    o_ref[...] = _snn_from_f32_query(
        q_ref[...].astype(jnp.float32), snt_ref, l_ref, bias_ref,
        inv_tau=inv_tau, apply_mask=apply_mask, bf16_exp=bf16_exp,
        out_dtype=o_ref.dtype)


def _fused_fwd_snn_kernel(x_ref, w1_ref, b1_ref, w2_ref, b2_ref,
                          snt_ref, l_ref, bias_ref, rep_ref, probs_ref,
                          *, inv_tau, apply_mask, bf16_exp):
    # encoder: rep never leaves VMEM before feeding the snn path
    h = jnp.dot(x_ref[...], w1_ref[...], preferred_element_type=jnp.float32)
    h = jnp.maximum(h + b1_ref[...], 0.0)
    rep = jnp.dot(h.astype(w2_ref.dtype), w2_ref[...],
                  preferred_element_type=jnp.float32) + b2_ref[...]
    rep_ref[...] = rep.astype(rep_ref.dtype)
    probs_ref[...] = _snn_from_f32_query(
        rep, snt_ref, l_ref, bias_ref, inv_tau=inv_tau, apply_mask=apply_mask,
        bf16_exp=bf16_exp, out_dtype=probs_ref.dtype)


# ----------------------------------------------------------------------------
# Wrappers
# ----------------------------------------------------------------------------
def grafn_snn(query, supports, labels, tau=0.1):
    """Standalone snn (for queries that are not the encoder output)."""
    cap, bf16_exp, row_target = _chip_config()
    n, _ = query.shape
    c = labels.shape[1]

    snt, lp, bias, d_p, ns_p, c_p, apply_mask = _prep_supports(
        supports, labels, row_target=row_target)

    n8 = _round_up(n, _SUBLANE)

    def est(tm):
        return (2 * tm * d_p * 4 + 2 * tm * c_p * 4        # streamed query / probs
                + 2 * d_p * ns_p * 2 + 2 * ns_p * c_p * 2  # resident supports^T / labels
                + 2 * ns_p * 4                             # pad-mask bias
                + 3 * tm * ns_p * 4 + tm * d_p * 4)        # live logits/e/p + qn

    tm = _choose_row_tile(n8, row_target, cap, est)
    n_p = _round_up(n8, tm)

    qp = _pad2d(query, n_p, d_p).astype(jnp.float32)       # normalize in f32

    kernel = functools.partial(_snn_kernel, inv_tau=float(1.0 / tau),
                               apply_mask=apply_mask, bf16_exp=bf16_exp)

    out = pl.pallas_call(
        kernel,
        out_shape=jax.ShapeDtypeStruct((n_p, c_p), jnp.float32),
        grid_spec=pltpu.PrefetchScalarGridSpec(
            num_scalar_prefetch=0,
            grid=(n_p // tm,),
            in_specs=[
                pl.BlockSpec((tm, d_p), lambda i: (i, 0)),     # streamed query rows
                pl.BlockSpec((d_p, ns_p), lambda i: (0, 0)),   # resident supports^T
                pl.BlockSpec((ns_p, c_p), lambda i: (0, 0)),   # resident labels (bf16)
                pl.BlockSpec((1, ns_p), lambda i: (0, 0)),     # resident pad-mask bias
            ],
            out_specs=pl.BlockSpec((tm, c_p), lambda i: (i, 0)),
        ),
        compiler_params=pltpu.CompilerParams(
            dimension_semantics=("parallel",),
            vmem_limit_bytes=_vmem_limit_bytes(est(tm), cap)),
    )(qp, snt, lp, bias)
    return out[:n, :c]


def grafn_forward_snn(x, w1, b1, w2, b2, supports, labels, tau=0.1):
    """Fused encoder + snn hot path: returns (rep, probs); rep never round-trips HBM."""
    cap, bf16_exp, row_target = _chip_config()
    n, d_in = x.shape
    d_hid = w1.shape[1]
    d_out = w2.shape[1]
    c = labels.shape[1]
    assert supports.shape[1] == d_out

    d_in_p = _round_up(d_in, _LANE)
    d_hid_p = _round_up(d_hid, _LANE)

    snt, lp, bias, d_out_p, ns_p, c_p, apply_mask = _prep_supports(
        supports, labels, row_target=row_target)

    n8 = _round_up(n, _SUBLANE)

    def est(tm):
        return (2 * tm * d_in_p * 2                          # streamed x (bf16)
                + 2 * tm * d_out_p * 4 + 2 * tm * c_p * 4    # rep / probs out tiles
                + 2 * (d_in_p * d_hid_p + d_hid_p * d_out_p) * 2   # resident W1/W2
                + 2 * (d_hid_p + d_out_p) * 4                # biases
                + 2 * d_out_p * ns_p * 2 + 2 * ns_p * c_p * 2 + 2 * ns_p * 4
                + tm * d_hid_p * 4 + tm * d_out_p * 4        # live h / rep
                + 3 * tm * ns_p * 4)                         # live logits/e/p

    tm = _choose_row_tile(n8, row_target, cap, est)
    n_p = _round_up(n8, tm)

    xp = _pad2d(x, n_p, d_in_p).astype(jnp.bfloat16)
    w1p = _pad2d(w1, d_in_p, d_hid_p).astype(jnp.bfloat16)
    b1p = _pad2d(b1, 1, d_hid_p).astype(jnp.float32)
    w2p = _pad2d(w2, d_hid_p, d_out_p).astype(jnp.bfloat16)
    b2p = _pad2d(b2, 1, d_out_p).astype(jnp.float32)

    kernel = functools.partial(_fused_fwd_snn_kernel, inv_tau=float(1.0 / tau),
                               apply_mask=apply_mask, bf16_exp=bf16_exp)

    rep_p, probs_p = pl.pallas_call(
        kernel,
        out_shape=(jax.ShapeDtypeStruct((n_p, d_out_p), jnp.float32),
                   jax.ShapeDtypeStruct((n_p, c_p), jnp.float32)),
        grid_spec=pltpu.PrefetchScalarGridSpec(
            num_scalar_prefetch=0,
            grid=(n_p // tm,),
            in_specs=[
                pl.BlockSpec((tm, d_in_p), lambda i: (i, 0)),       # streamed rows
                pl.BlockSpec((d_in_p, d_hid_p), lambda i: (0, 0)),  # resident W1
                pl.BlockSpec((1, d_hid_p), lambda i: (0, 0)),       # resident b1
                pl.BlockSpec((d_hid_p, d_out_p), lambda i: (0, 0)), # resident W2
                pl.BlockSpec((1, d_out_p), lambda i: (0, 0)),       # resident b2
                pl.BlockSpec((d_out_p, ns_p), lambda i: (0, 0)),    # resident supports^T
                pl.BlockSpec((ns_p, c_p), lambda i: (0, 0)),        # resident labels
                pl.BlockSpec((1, ns_p), lambda i: (0, 0)),          # resident pad mask
            ],
            out_specs=(pl.BlockSpec((tm, d_out_p), lambda i: (i, 0)),
                       pl.BlockSpec((tm, c_p), lambda i: (i, 0))),
        ),
        compiler_params=pltpu.CompilerParams(
            dimension_semantics=("parallel",),
            vmem_limit_bytes=_vmem_limit_bytes(est(tm), cap)),
    )(xp, w1p, b1p, w2p, b2p, snt, lp, bias)
    return rep_p[:n, :d_out], probs_p[:n, :c]


# ----------------------------------------------------------------------------
# Reference implementations (plain JAX, f32) for correctness checks
# ----------------------------------------------------------------------------
def _forward_ref(x, w1, b1, w2, b2):
    h = jnp.maximum(x @ w1 + b1, 0.0)
    return h @ w2 + b2


def _snn_ref(q, s, l, tau):
    qn = q / jnp.maximum(jnp.linalg.norm(q, axis=-1, keepdims=True), 1e-12)
    sn = s / jnp.maximum(jnp.linalg.norm(s, axis=-1, keepdims=True), 1e-12)
    return jax.nn.softmax(qn @ sn.T / tau, axis=1) @ l


if __name__ == "__main__":
    # Small, deterministic synthetic setup.
    N, IN_DIM, HIDDEN, OUT_DIM = 8, 32, 64, 16   # nodes, feat, hidden, rep dim
    N_SUPPORT, N_CLASSES = 16, 4
    TAU = 0.1

    key = jax.random.PRNGKey(0)
    kx, kw1, kb1, kw2, kb2, ks, kl = jax.random.split(key, 7)

    x = jax.random.normal(kx, (N, IN_DIM), dtype=jnp.float32)

    # deterministic encoder params (synthetic init, ~Glorot scale)
    w1 = jax.random.normal(kw1, (IN_DIM, HIDDEN), dtype=jnp.float32) * (1.0 / IN_DIM) ** 0.5
    b1 = jax.random.normal(kb1, (1, HIDDEN), dtype=jnp.float32) * 0.01
    w2 = jax.random.normal(kw2, (HIDDEN, OUT_DIM), dtype=jnp.float32) * (1.0 / HIDDEN) ** 0.5
    b2 = jax.random.normal(kb2, (1, OUT_DIM), dtype=jnp.float32) * 0.01

    # synthetic supports / one-hot label matrix for the snn path
    supports = jax.random.normal(ks, (N_SUPPORT, OUT_DIM), dtype=jnp.float32)
    label_ids = jax.random.randint(kl, (N_SUPPORT,), 0, N_CLASSES)
    labels = jax.nn.one_hot(label_ids, N_CLASSES, dtype=jnp.float32)

    # 1) forward pass:  rep = encoder(x)   (module forward semantics)
    rep = grafn_forward(x, w1, b1, w2, b2)

    # 2) fused hot path: encoder + snn in one kernel (no rep HBM round trip)
    rep_fused, probs_fused = grafn_forward_snn(x, w1, b1, w2, b2,
                                               supports, labels, tau=TAU)

    # 3) standalone snn (for queries that are not the encoder output)
    probs = grafn_snn(rep, supports, labels, tau=TAU)

    jax.block_until_ready((rep, rep_fused, probs_fused, probs))

    # correctness checks against plain-JAX f32 references (bf16 MXU operands
    # with f32 accumulation -> looser tolerances)
    rep_ref = _forward_ref(x, w1, b1, w2, b2)
    assert jnp.allclose(rep, rep_ref, atol=5e-2, rtol=5e-2), "encoder mismatch"
    assert jnp.allclose(rep_fused, rep_ref, atol=5e-2, rtol=5e-2), "fused encoder mismatch"

    probs_ref = _snn_ref(rep, supports, labels, TAU)        # same query isolates snn error
    assert jnp.allclose(probs, probs_ref, atol=5e-2, rtol=5e-2), "snn mismatch"

    probs_fused_ref = _snn_ref(rep_fused, supports, labels, TAU)
    assert jnp.allclose(probs_fused, probs_fused_ref, atol=5e-2, rtol=5e-2), \
        "fused snn mismatch"

    # TODO(synk): loss() involves data-dependent boolean gather / scatter_ over
    # nodes (torch.arange[boolean], targets[train_mask] = gt_matrix); left to
    # host-side JAX glue around these kernels.
    print("KERNEL_OK")
</pallas_src>

<mosaic_0001>
module attributes {stable_mosaic.version = 11 : i64} {
  func.func @_encoder_kernel(%arg0: i32, %arg1: memref<8x128xbf16, #tpu.memory_space<vmem>>, %arg2: memref<128x128xbf16, #tpu.memory_space<vmem>>, %arg3: memref<1x128xf32, #tpu.memory_space<vmem>>, %arg4: memref<128x128xbf16, #tpu.memory_space<vmem>>, %arg5: memref<1x128xf32, #tpu.memory_space<vmem>>, %arg6: memref<8x128xf32, #tpu.memory_space<vmem>>) attributes {dimension_semantics = [#tpu.dimension_semantics<parallel>], iteration_bounds = array<i64: 1>, scalar_prefetch = 0 : i64, scratch_operands = 0 : i64, tpu.core_type = #tpu.core_type<tc>, window_params = [{transform_indices = @transform_0, window_bounds = array<i64: 8, 128>}, {pipeline_mode = #tpu.pipeline_mode<synchronous>, transform_indices = @transform_1, window_bounds = array<i64: 128, 128>}, {pipeline_mode = #tpu.pipeline_mode<synchronous>, transform_indices = @transform_2, window_bounds = array<i64: 1, 128>}, {pipeline_mode = #tpu.pipeline_mode<synchronous>, transform_indices = @transform_3, window_bounds = array<i64: 128, 128>}, {pipeline_mode = #tpu.pipeline_mode<synchronous>, transform_indices = @transform_4, window_bounds = array<i64: 1, 128>}, {transform_indices = @transform_5, window_bounds = array<i64: 8, 128>}]} {
    %c0 = arith.constant 0 : index
    %c0_0 = arith.constant 0 : index
    %0 = vector.load %arg1[%c0, %c0_0] : memref<8x128xbf16, #tpu.memory_space<vmem>>, vector<8x128xbf16>
    %c0_1 = arith.constant 0 : index
    %c0_2 = arith.constant 0 : index
    %1 = vector.load %arg2[%c0_1, %c0_2] : memref<128x128xbf16, #tpu.memory_space<vmem>>, vector<128x128xbf16>
    %cst = arith.constant dense<0.000000e+00> : vector<8x128xf32>
    %2 = tpu.matmul %0, %1, %cst {dimension_numbers = #tpu.dot_dimension_numbers<[1], [0], [0], [1], [0, 0, 1, 1], [], []>} : vector<8x128xbf16>, vector<128x128xbf16>, vector<8x128xf32> -> vector<8x128xf32>
    %c0_3 = arith.constant 0 : index
    %c0_4 = arith.constant 0 : index
    %3 = vector.load %arg3[%c0_3, %c0_4] : memref<1x128xf32, #tpu.memory_space<vmem>>, vector<1x128xf32>
    %4 = vector.broadcast %3 : vector<1x128xf32> to vector<8x128xf32>
    %5 = arith.addf %2, %4 : vector<8x128xf32>
    %cst_5 = arith.constant 0.000000e+00 : f32
    %6 = vector.broadcast %cst_5 : f32 to vector<8x128xf32>
    %7 = arith.maximumf %5, %6 : vector<8x128xf32>
    %8 = arith.truncf %7 : vector<8x128xf32> to vector<8x128xbf16>
    %c0_6 = arith.constant 0 : index
    %c0_7 = arith.constant 0 : index
    %9 = vector.load %arg4[%c0_6, %c0_7] : memref<128x128xbf16, #tpu.memory_space<vmem>>, vector<128x128xbf16>
    %cst_8 = arith.constant dense<0.000000e+00> : vector<8x128xf32>
    %10 = tpu.matmul %8, %9, %cst_8 {dimension_numbers = #tpu.dot_dimension_numbers<[1], [0], [0], [1], [0, 0, 1, 1], [], []>} : vector<8x128xbf16>, vector<128x128xbf16>, vector<8x128xf32> -> vector<8x128xf32>
    %c0_9 = arith.constant 0 : index
    %c0_10 = arith.constant 0 : index
    %11 = vector.load %arg5[%c0_9, %c0_10] : memref<1x128xf32, #tpu.memory_space<vmem>>, vector<1x128xf32>
    %12 = vector.broadcast %11 : vector<1x128xf32> to vector<8x128xf32>
    %13 = arith.addf %10, %12 : vector<8x128xf32>
    %c0_11 = arith.constant 0 : index
    %c0_12 = arith.constant 0 : index
    %14 = vector.load %arg6[%c0_11, %c0_12] : memref<8x128xf32, #tpu.memory_space<vmem>>, vector<8x128xf32>
    tpu.vector_store %arg6[%c0_11, %c0_12], %13 {strides = array<i32>} : memref<8x128xf32, #tpu.memory_space<vmem>>, vector<8x128xf32>,
    return
  }
  func.func @transform_0(%arg0: i32) -> (i32, i32) {
    %c0_i32 = arith.constant 0 : i32
    %c0_i32_0 = arith.constant 0 : i32
    return %arg0, %c0_i32 : i32, i32
  }
  func.func @transform_1(%arg0: i32) -> (i32, i32) {
    %c0_i32 = arith.constant 0 : i32
    %c0_i32_0 = arith.constant 0 : i32
    %c0_i32_1 = arith.constant 0 : i32
    return %c0_i32, %c0_i32_0 : i32, i32
  }
  func.func @transform_2(%arg0: i32) -> (i32, i32) {
    %c0_i32 = arith.constant 0 : i32
    %c0_i32_0 = arith.constant 0 : i32
    %c0_i32_1 = arith.constant 0 : i32
    return %c0_i32, %c0_i32_0 : i32, i32
  }
  func.func @transform_3(%arg0: i32) -> (i32, i32) {
    %c0_i32 = arith.constant 0 : i32
    %c0_i32_0 = arith.constant 0 : i32
    %c0_i32_1 = arith.constant 0 : i32
    return %c0_i32, %c0_i32_0 : i32, i32
  }
  func.func @transform_4(%arg0: i32) -> (i32, i32) {
    %c0_i32 = arith.constant 0 : i32
    %c0_i32_0 = arith.constant 0 : i32
    %c0_i32_1 = arith.constant 0 : i32
    return %c0_i32, %c0_i32_0 : i32, i32
  }
  func.func @transform_5(%arg0: i32) -> (i32, i32) {
    %c0_i32 = arith.constant 0 : i32
    %c0_i32_0 = arith.constant 0 : i32
    return %arg0, %c0_i32 : i32, i32
  }
}

</mosaic_0001>

<bundles_post_ra>
// kernel: tpu_custom_call.1
= control target key start
LH: loop header
LB: loop body
LE: loop exit
PB: predicated region body
PF: predicated region fallthrough
CT: control target
= control target key end

     0   :  { %10 = vsyncpa [#allocation3], 0  ;;  %s494_s0 = inlined_call_operand.hbm [shape: bf16[8,128], index: 0, kind: input, shape index: {}]   ;;  %s495_s1 = inlined_call_operand.hbm [shape: bf16[128,128], index: 1, kind: input, shape index: {}]   ;;  %s496_s2 = inlined_call_operand.vmem [shape: f32[1,128], index: 2, kind: input, shape index: {}]   ;;  %s497_s3 = inlined_call_operand.hbm [shape: bf16[128,128], index: 3, kind: input, shape index: {}]   ;;  %s498_s4 = inlined_call_operand.vmem [shape: f32[1,128], index: 4, kind: input, shape index: {}]   ;;  %s499_s5 = inlined_call_operand.hbm [shape: f32[8,128], index: 5, kind: output, shape index: {}]  }
   0x1   :  { %11 = vsyncpa [#allocation6], 0  ;;  %s28_s20 = sshll.u32 %s495_s1, 4  ;;  %s29_s20 = int_to_ptr.hbm [resolvable:$true] %s28_s20 }
   0x2   :  { %12 = vsyncpa [#allocation4], 0  ;;  %s440_s21 = smov [#allocation5]   ;;  %s18_s25 = sshll.u32 %s494_s0, 4  ;;  %s19_s25 = int_to_ptr.hbm [resolvable:$true] %s18_s25 }
   0x3   :  { %s30_s22 = sshll.u32 %s440_s21, 4  ;;  %s441_s26 = smov 64   ;;  %s31_s22 = int_to_ptr.vmem [resolvable:$true] %s30_s22 }
   0x4   :  { %s442_s27 = smov 4   ;;  %s443_s28 = smov [#allocation2]  }
   0x5   :  { %36 = dma.hbm_to_vmem [thread:$0]  %s29_s20, 1024, %s31_s22, [#allocation6], %s441_s26, %s441_s26, %s442_s27  }
   0x6   :  { %s20_s29 = sshll.u32 %s443_s28, 4  ;;  %s43_s7 = sshll.u32 %s497_s3, 4  ;;  %s21_s29 = int_to_ptr.vmem [resolvable:$true] %s20_s29  ;;  %s44_s7 = int_to_ptr.hbm [resolvable:$true] %s43_s7 }
   0x7   :  { %23 = dma.hbm_to_vmem [thread:$0]  %s19_s25, 64, %s21_s29, [#allocation3]  }
   0x8   :  { %s444_s1 = smov [#allocation7]  }
   0x9   :  { %s45_s8 = sshll.u32 %s444_s1, 4  ;;  %s46_s8 = int_to_ptr.vmem [resolvable:$true] %s45_s8 }
   0xa   :  { %51 = dma.hbm_to_vmem [thread:$0]  %s44_s7, 1024, %s46_s8, [#allocation6], %s441_s26, %s441_s26, %s442_s27  }
   0xb   :  { %434 = dma.done.wait [#allocation3], 64  }
   0xc   :  { %435 = vsyncadd [#allocation3], 4294967232 }
   0xd   :  { %436 = dma.done.wait [#allocation6], 2048  }
   0xe   :  { %437 = vsyncadd [#allocation6], 4294965248  ;;  %v321_v0 = vld [vmem:[#allocation5 + $0x38] sm:$0xff]  ;;  %v320_v1 = vld [vmem:[#allocation5 + $0x30] sm:$0xff]  ;;  %s445_s11 = smov [#allocation8]   ;;  %s239_s15 = sshll.u32 %s499_s5, 4  ;;  %s240_s15 = int_to_ptr.hbm [resolvable:$true] %s239_s15 }
   0xf   :  { %135 = vmatpush.bf16.msra.mxu0 %v321_v0  ;;  %v329_v2 = vld [vmem:[#allocation7 + $0x38] sm:$0xff]  ;;  %v328_v3 = vld [vmem:[#allocation7 + $0x30] sm:$0xff]  ;;  %v319_v4 = vld [vmem:[#allocation5 + $0x28] sm:$0xff]  ;;  %s237_s12 = sshll.u32 %s445_s11, 4  ;;  %s238_s12 = int_to_ptr.vmem [resolvable:$true] %s237_s12 }
  0x10   :  { %218 = vmatpush.bf16.msra.mxu1 %v329_v2  ;;  %v327_v5 = vld [vmem:[#allocation7 + $0x28] sm:$0xff]  ;;  %v318_v6 = vld [vmem:[#allocation5 + $0x20] sm:$0xff]  ;;  %v317_v8 = vld [vmem:[#allocation5 + $0x18] sm:$0xff] }
  0x11   :  { %v326_v7 = vld [vmem:[#allocation7 + $0x20] sm:$0xff]  ;;  %v325_v9 = vld [vmem:[#allocation7 + $0x18] sm:$0xff]  ;;  %v316_v10 = vld [vmem:[#allocation5 + $0x10] sm:$0xff] }
  0x12   :  { %v324_v11 = vld [vmem:[#allocation7 + $0x10] sm:$0xff]  ;;  %v315_v12 = vld [vmem:[#allocation5 + $0x8] sm:$0xff]  ;;  %v314_v13 = vld [vmem:[#allocation5] sm:$0xff] }
  0x13   :  { %136 = vmatpush.bf16.msra.mxu0 %v320_v1  ;;  %v66_v14 = vld [vmem:[#allocation2] sm:$0xf]  ;;  %v323_v15 = vld [vmem:[#allocation7 + $0x8] sm:$0xff]  ;;  %v322_v16 = vld [vmem:[#allocation7] sm:$0xff] }
  0x14   :  { %219 = vmatpush.bf16.msra.mxu1 %v328_v3  ;;  %v336_v17 = vld [vmem:[%s496_s2] ss:$0 sm:$0xff] }
  0x15   :  { %v337_v23 = vld [vmem:[%s498_s4] ss:$0 sm:$0xff] }
  0x17   :  { %137 = vmatpush.bf16.msra.mxu0 %v319_v4 }
  0x18   :  { %220 = vmatpush.bf16.msra.mxu1 %v327_v5 }
  0x1b   :  { %138 = vmatpush.bf16.msra.mxu0 %v318_v6 }
  0x1c   :  { %221 = vmatpush.bf16.msra.mxu1 %v326_v7 }
  0x1f   :  { %139 = vmatpush.bf16.msra.mxu0 %v317_v8 }
  0x20   :  { %222 = vmatpush.bf16.msra.mxu1 %v325_v9 }
  0x23   :  { %140 = vmatpush.bf16.msra.mxu0 %v316_v10 }
  0x24   :  { %223 = vmatpush.bf16.msra.mxu1 %v324_v11 }
  0x27   :  { %141 = vmatpush.bf16.msra.mxu0 %v315_v12 }
  0x28   :  { %224 = vmatpush.bf16.msra.mxu1 %v323_v15 }
  0x2b   :  { %142 = vmatpush.bf16.msra.mxu0 %v314_v13 }
  0x2c   :  { %225 = vmatpush.bf16.msra.mxu1 %v322_v16 }
  0x2e   :  { %143 = vmatmul.bf16.vlgmr.msra.gmra.mxu0 %v66_v14 }
  0xab   :  { %v144_v18 = vpop.f32.mrf.mxu0 }
  0xac   :  { %v145_v19 = vadd.f32 %v336_v17, %v144_v18 }
  0xae   :  { %v148_v20 = vmax.f32 %v145_v19, 0.0 }
  0xb0   :  { %v149_v21 = vpack.c.bf16 %v148_v20, %v148_v20 }
  0xb2   :  { %226 = vmatmul.bf16.vlgmr.msra.gmra.mxu1 %v149_v21 }
  0xb3   :  { %v146_v22 = vpop.f32.mrf.mxu0 }
 0x12f   :  { %v227_v24 = vpop.f32.mrf.mxu1 }
 0x130   :  { %v228_v25 = vadd.f32 %v337_v23, %v227_v24 }
 0x132   :  { %231 = vst [vmem:[#allocation8] sm:$0xff] %v228_v25 }
 0x133   :  { %242 = dma.vmem_to_hbm [thread:$0]  %s238_s12, 128, %s240_s15, [#allocation4]  }
 0x137   :  { %v229_v26 = vpop.f32.mrf.mxu1 }
 0x138   :  { %438 = dma.done.wait [#allocation4], 128  }
 0x139   :  { %439 = vsyncadd [#allocation4], 4294967168 }
 0x13a   :  { %247 = vsyncpa [#allocation3], 1 }
 0x13b   :  { %248 = vsyncpa [#allocation6], 1 }
 0x13c   :  { %249 = vsyncpa [#allocation4], 1 }

</bundles_post_ra>
